<compile_context>
chip_gen: v6e
topology: v6e:2x2x1
jax: 0.10.0
libtpu: 0.0.40
codegen_flags: <defaults>
</compile_context>

<pallas_src>
import functools
import math

import jax
import jax.numpy as jnp
from jax import lax
from jax.experimental import pallas as pl
from jax.experimental.pallas import tpu as pltpu


def _round_up(x: int, m: int) -> int:
    return ((x + m - 1) // m) * m


def _hash_u32(x):
    """lowbias32 integer hash (uint32 in/out).  Non-TPU fallback only."""
    x = x ^ (x >> 16)
    x = x * jnp.uint32(0x7FEB352D)
    x = x ^ (x >> 15)
    x = x * jnp.uint32(0x846CA68B)
    x = x ^ (x >> 16)
    return x


def _pe_kernel(seed_ref, x_ref, pe_ref, o_ref, *,
               p: float, training: bool, use_hw_prng: bool):
    # x_ref / o_ref: (ts, D) (batch dim squeezed); pe_ref: (ts, D).
    y = x_ref[...] + pe_ref[...]

    if training and p > 0.0:
        ts, d = y.shape
        s = pl.program_id(0)          # sequence-tile index (outer grid axis)
        b = pl.program_id(1)          # batch index (inner grid axis)
        threshold = jnp.uint32(min(int(round(p * 2.0 ** 32)), 2 ** 32 - 1))

        if use_hw_prng:
            # Hardware PRNG: ~3 VPU ops/elem for the dropout path.
            step = s * pl.num_programs(1) + b
            pltpu.prng_seed(seed_ref[0] + step)
            bits = pltpu.prng_random_bits((ts, d))
            if bits.dtype != jnp.uint32:
                bits = pltpu.bitcast(bits, jnp.uint32)
        else:
            # Stateless counter-hash fallback (interpret / non-TPU backends).
            seed_u = seed_ref[0].astype(jnp.uint32)
            base = ((b * pl.num_programs(0) + s) * ts).astype(jnp.uint32)
            row = lax.broadcasted_iota(jnp.uint32, (ts, d), 0)
            col = lax.broadcasted_iota(jnp.uint32, (ts, d), 1)
            idx = (base + row) * jnp.uint32(d) + col
            bits = _hash_u32(idx ^ (seed_u * jnp.uint32(0x9E3779B1)))

        keep = bits >= threshold                        # P(keep) = 1 - p
        scale = jnp.float32(1.0 / (1.0 - p))            # scale in f32 (no bf16 bias)
        y = jnp.where(keep, y.astype(jnp.float32) * scale, jnp.float32(0.0))

    o_ref[...] = y.astype(o_ref.dtype)


def make_positional_encoding(max_len: int, d_model: int, dtype=jnp.float32):
    """Same formula as the PyTorch __init__ (sin on even dims, cos on odd)."""
    position = jnp.arange(max_len, dtype=jnp.float32)[:, None]
    div_term = jnp.exp(
        jnp.arange(0, d_model, 2, dtype=jnp.float32) * -(math.log(10000.0) / d_model)
    )
    pe = jnp.zeros((max_len, d_model), dtype=jnp.float32)
    pe = pe.at[:, 0::2].set(jnp.sin(position * div_term))
    pe = pe.at[:, 1::2].set(jnp.cos(position * div_term))
    return pe.astype(dtype)


def positional_encoding_forward(x, pe, *, dropout_p: float = 0.1,
                                training: bool = False, seed: int = 0):
    """x: (B, S, D); pe: (max_len, D) with max_len >= S."""
    B, S, D = x.shape
    dtype = x.dtype
    if pe.shape[0] < S or pe.shape[1] != D:
        raise ValueError(f"pe shape {pe.shape} incompatible with x shape {x.shape}")

    # torch.nn.Dropout(p=1.0) zeros the whole tensor; avoid inf scale in-kernel.
    if training and dropout_p >= 1.0:
        return jnp.zeros_like(x)

    itemsize = jnp.dtype(dtype).itemsize
    pe = pe.astype(dtype)                                # tiny one-time cast

    # --- VMEM-aware tile sizing (v5e/v6e: 128 MiB, v7x: 64 MiB) -------------
    try:
        vmem_bytes = int(pltpu.get_tpu_info().vmem_capacity_bytes)
    except Exception:
        vmem_bytes = 64 * 1024 * 1024                    # conservative (v7x)
    # x, out, pe each double-buffered -> ~6 live tiles; target per-buffer size.
    per_buf = max(512 * 1024, min(8 * 1024 * 1024, vmem_bytes // 16))

    row_bytes = D * itemsize
    s_rounded = _round_up(S, 8)
    ts = max(8, (per_buf // row_bytes) // 8 * 8)
    ts = min(ts, s_rounded)
    num_s_tiles = pl.cdiv(S, ts)

    # v7x megacore: make sure there are >= 2 grid steps when possible.
    if B == 1 and num_s_tiles == 1 and s_rounded >= 16:
        ts = min(s_rounded, _round_up(pl.cdiv(s_rounded, 2), 8))
        num_s_tiles = pl.cdiv(S, ts)

    tile_bytes = ts * row_bytes
    vmem_limit = int(min(vmem_bytes // 2, max(32 * 1024 * 1024, 8 * tile_bytes)))

    use_hw_prng = jax.devices()[0].platform == "tpu"

    kernel = functools.partial(
        _pe_kernel, p=float(dropout_p), training=bool(training),
        use_hw_prng=use_hw_prng)

    seed_arr = jnp.array([int(seed) & 0x7FFFFFFF], dtype=jnp.int32)

    n_elem = B * S * D
    cost = pl.CostEstimate(
        flops=n_elem,                                    # one add per element
        transcendentals=0,
        bytes_accessed=(2 * n_elem + S * D) * itemsize)

    # TODO(synk): for very large D with large B, block a few batch elements per
    # grid step (Bb, ts, D) to amortize per-step pipeline overhead.
    out = pl.pallas_call(
        kernel,
        out_shape=jax.ShapeDtypeStruct((B, S, D), dtype),
        grid_spec=pltpu.PrefetchScalarGridSpec(
            num_scalar_prefetch=1,                        # seed lands in SMEM
            grid=(num_s_tiles, B),                        # batch innermost: pe tile stays resident
            in_specs=[
                pl.BlockSpec((None, ts, D), lambda s, b, seed_ref: (b, s, 0)),
                pl.BlockSpec((ts, D), lambda s, b, seed_ref: (s, 0)),
            ],
            out_specs=pl.BlockSpec((None, ts, D), lambda s, b, seed_ref: (b, s, 0)),
        ),
        compiler_params=pltpu.CompilerParams(
            dimension_semantics=("parallel", "parallel"),
            vmem_limit_bytes=vmem_limit,
        ),
        cost_estimate=cost,
    )(seed_arr, x, pe)
    return out


if __name__ == "__main__":
    B, S, D = 2, 8, 32
    max_len = 64
    dropout_p = 0.1

    key = jax.random.PRNGKey(0)
    x = jax.random.normal(key, (B, S, D), dtype=jnp.float32)

    pe = make_positional_encoding(max_len, D)

    # Eval mode (dropout = identity): must match x + pe[:S] exactly.
    out_eval = positional_encoding_forward(x, pe, dropout_p=dropout_p, training=False)
    jax.block_until_ready(out_eval)
    ref = x + pe[:S][None, :, :]
    assert jnp.allclose(out_eval, ref, atol=1e-6), "eval-mode mismatch vs reference"

    # Training mode (in-kernel dropout): every element is either exactly zero
    # or the reference value scaled by 1/(1-p).
    out_train = positional_encoding_forward(
        x, pe, dropout_p=dropout_p, training=True, seed=1234
    )
    jax.block_until_ready(out_train)
    assert out_train.shape == (B, S, D)
    scaled_ref = ref * (1.0 / (1.0 - dropout_p))
    ok = (out_train == 0) | jnp.isclose(out_train, scaled_ref, atol=1e-5)
    assert bool(jnp.all(ok)), "training-mode dropout output inconsistent with x + pe"

    print("KERNEL_OK")
</pallas_src>

<mosaic_0001>
module attributes {stable_mosaic.version = 11 : i64} {
  func.func @_pe_kernel(%arg0: i32, %arg1: i32, %arg2: memref<1xi32, #tpu.memory_space<smem>>, %arg3: memref<1x8x32xf32, #tpu.memory_space<vmem>>, %arg4: memref<8x32xf32, #tpu.memory_space<vmem>>, %arg5: memref<1x8x32xf32, #tpu.memory_space<vmem>>) attributes {dimension_semantics = [#tpu.dimension_semantics<parallel>, #tpu.dimension_semantics<parallel>], iteration_bounds = array<i64: 1, 2>, scalar_prefetch = 1 : i64, scratch_operands = 0 : i64, tpu.core_type = #tpu.core_type<tc>, window_params = [{transform_indices = @transform_0, window_bounds = array<i64: 1, 8, 32>}, {transform_indices = @transform_1, window_bounds = array<i64: 8, 32>}, {transform_indices = @transform_2, window_bounds = array<i64: 1, 8, 32>}]} {
    %c0 = arith.constant 0 : index
    %c0_0 = arith.constant 0 : index
    %c0_1 = arith.constant 0 : index
    %0 = vector.load %arg3[%c0, %c0_0, %c0_1] : memref<1x8x32xf32, #tpu.memory_space<vmem>>, vector<1x8x32xf32>
    %1 = vector.shape_cast %0 : vector<1x8x32xf32> to vector<8x32xf32>
    %c0_2 = arith.constant 0 : index
    %c0_3 = arith.constant 0 : index
    %2 = vector.load %arg4[%c0_2, %c0_3] : memref<8x32xf32, #tpu.memory_space<vmem>>, vector<8x32xf32>
    %3 = arith.addf %1, %2 : vector<8x32xf32>
    %c0_4 = arith.constant 0 : index
    %c0_5 = arith.constant 0 : index
    %c0_6 = arith.constant 0 : index
    %4 = vector.load %arg5[%c0_4, %c0_5, %c0_6] : memref<1x8x32xf32, #tpu.memory_space<vmem>>, vector<1x8x32xf32>
    %5 = vector.shape_cast %4 : vector<1x8x32xf32> to vector<8x32xf32>
    %6 = vector.shape_cast %3 : vector<8x32xf32> to vector<1x8x32xf32>
    tpu.vector_store %arg5[%c0_4, %c0_5, %c0_6], %6 {strides = array<i32>} : memref<1x8x32xf32, #tpu.memory_space<vmem>>, vector<1x8x32xf32>,
    return
  }
  func.func @transform_0(%arg0: i32, %arg1: i32, %arg2: memref<1xi32, #tpu.memory_space<smem>>) -> (i32, i32, i32) {
    %c0_i32 = arith.constant 0 : i32
    %c0_i32_0 = arith.constant 0 : i32
    return %arg1, %arg0, %c0_i32 : i32, i32, i32
  }
  func.func @transform_1(%arg0: i32, %arg1: i32, %arg2: memref<1xi32, #tpu.memory_space<smem>>) -> (i32, i32) {
    %c0_i32 = arith.constant 0 : i32
    %c0_i32_0 = arith.constant 0 : i32
    return %arg0, %c0_i32 : i32, i32
  }
  func.func @transform_2(%arg0: i32, %arg1: i32, %arg2: memref<1xi32, #tpu.memory_space<smem>>) -> (i32, i32, i32) {
    %c0_i32 = arith.constant 0 : i32
    %c0_i32_0 = arith.constant 0 : i32
    return %arg1, %arg0, %c0_i32 : i32, i32, i32
  }
}

</mosaic_0001>

<bundles_post_ra>
// kernel: tpu_custom_call.1
= control target key start
LH: loop header
LB: loop body
LE: loop exit
PB: predicated region body
PF: predicated region fallthrough
CT: control target
= control target key end

     0   :  { %9 = vsyncpa [#allocation5], 0  ;;  %s557_s0 = inlined_call_operand.<no memory space> [shape: s32[1], index: 0, kind: input, shape index: {}]   ;;  %s558_s1 = inlined_call_operand.vmem [shape: f32[2,8,32], index: 1, kind: input, shape index: {}]   ;;  %s559_s2 = inlined_call_operand.vmem [shape: f32[64,32], index: 2, kind: input, shape index: {}]   ;;  %s560_s3 = inlined_call_operand.hbm [shape: f32[2,8,32], index: 3, kind: output, shape index: {}]  }
   0x1   :  { %11 = vsyncpa [#allocation5 + $0x1], 0  ;;  %s455_s12 = smov 0   ;;  %s457_s13 = smov 0  }
   0x2   :  { %s459_s14 = smov 0   ;;  %s461_s15 = smov 0  }
   0x3   :  { %s463_s0 = smov 0   ;;  %s465_s16 = smov 0  }
   0x4 LB: > { %s289_s17 = sadd.s32 4294967295, %s432_s16   ;;  %s290_s18 = sadd.s32 4294967294, %s432_s16   ;;  %s432_s16 = sphi %s465_s16, %s17_s16   ;;  %s428_s0 = sphi %s463_s0, %s567_s0   ;;  %s424_s15 = sphi %s461_s15, %s566_s15   ;;  %s420_s14 = sphi %s459_s14, %s565_s14   ;;  %s416_s13 = sphi %s457_s13, %s564_s13   ;;  %s412_s12 = sphi %s455_s12, %s563_s12  }
   0x5   : > { %s26_s19 = sadd.s32 1, %s428_s0  ;;  %s92_s20 = sadd.s32 1, %s420_s14 }
   0x6   : > { %p27_p0 = scmp.ge.s32.totalorder %s26_s19, 2  ;;  %p102_p1 = scmp.ne.s32.totalorder %s420_s14, %s416_s13 }
   0x7   : > { %p103_p2 = scmp.eq.s32.totalorder %s289_s17, 1  ;;  %p108_p3 = scmp.ne.s32.totalorder %s416_s13, %s412_s12 }
   0x8   : > { %s569_s19 = smov (%p27_p0, %s26_s19), 0  ;;  %p109_p5 = scmp.eq.s32.totalorder %s290_s18, 1 }
   0x9   : > { %p495_p4 = por %p103_p2, %p102_p1  ;;  %s87_s22 = ssub.s32 %s428_s0, %s569_s19 }
   0xa   : > { %p294_p6 = scmp.ge.s32.totalorder %s432_s16, 1  ;;  %p90_p7 = scmp.eq.s32.totalorder %s87_s22, 0 }
   0xb   : > { %p502_p8 = por %p109_p5, %p108_p3  ;;  %p144_p9 = scmp.lt.s32.totalorder %s432_s16, 3 }
   0xc   : > { %s508_s24 = scalar_select %p90_p7, %s420_s14, %s92_s20  }
   0xd   : > { %p145_p10 = pnand %p294_p6, %p144_p9 }
   0xe   : > { %s169_s25 = sand.u32 (!%p145_p10), 1, %s416_s13   ;;  %p172_p11 = scmp.lt.s32.totalorder (!%p145_p10), %s424_s15, 1 }
   0xf   : > { %148 = sbr.rel (%p145_p10) target bundleno = 42 (0x2a), region = 28  ;;  %s295_s26 = sshll.u32 (!%p145_p10), %s169_s25, 3 }
  0x10   : > { %s298_s28 = sshll.u32 (!%p145_p10), %s424_s15, 7  ;;  %s171_s5 = scalar_lea.vmem (!%p145_p10), [#allocation4], %s295_s26 }
  0x11   : > { %s203_s6 = sshll.u32 (!%p145_p10), %s171_s5, 4  ;;  %s201_s17 = scalar_lea.hbm (!%p145_p10), %s560_s3, %s298_s28  ;;  %s204_s6 = int_to_ptr.vmem [resolvable:$true] %s203_s6 }
  0x12   : > { %s356_s18 = scalar_lea.vmem (!%p145_p10), %s204_s6, 128  ;;  %s434_s20 = smov (!%p145_p10), [#allocation4]  }
  0x13   : > { %p357_p12 = scmp.ne.s32.totalorder (!%p145_p10), %s204_s6, %s356_s18  ;;  %s360_s22 = sshll.u32 (!%p145_p10), %s434_s20, 4  ;;  %s361_s22 = int_to_ptr.vmem [resolvable:$false] %s360_s22 }
  0x14   : > { %s173_s27 = scalar_select %p172_p11, %s424_s15, 1  ;;  %v184_v0 = vld [vmem:[%s559_s2] sm:$0xff]  ;;  %vm186_vm0 = vcmask 261120  }
  0x15   : > { %s189_s15 = scalar_lea.sflag [#allocation5], %s169_s25  ;;  %p358_p13 = pnand %p357_p12, %p495_p4 }
  0x16   : > { %s296_s29 = sshll.u32 %s173_s27, 3  ;;  %s362_s26 = scalar_lea.vmem %s361_s22, 256 }
  0x17   : > { %s178_s9 = scalar_lea.vmem %s558_s1, %s296_s29  ;;  %p359_p0 = pneg %p358_p13 }
  0x18   : > { %v183_v1 = vld [vmem:[%s178_s9] sm:$0xff]  ;;  %p363_p1 = scmp.lt.s32.totalorder %s204_s6, %s361_s22  ;;  %p364_p2 = scmp.lt.s32.totalorder %s362_s26, %s356_s18 }
  0x19   : > { %v185_v2 = vadd.f32 %v184_v0, %v183_v1 }
  0x1a   : > { %p365_p3 = por %p364_p2, %p363_p1 }
  0x1b   : > { %187 = vst.msk [vmem:[%s171_s5] sm:$0xff] %vm186_vm0, %v185_v2 }
  0x1c   : > { %p366_p5 = pnand %p365_p3, %p359_p0 }
  0x1e   : > { %369 = shalt.err (!%p366_p5)
}
  0x1f   : > { %s370_s27 = scalar_lea.hbm %s201_s17, 128  ;;  %s374_s29 = scalar_lea.hbm %s560_s3, 256 }
  0x20   : > { %p371_p6 = scmp.ne.s32.totalorder %s201_s17, %s370_s27  ;;  %p375_p10 = scmp.lt.s32.totalorder %s201_s17, %s560_s3 }
  0x21   : > { %p376_p11 = scmp.lt.s32.totalorder %s374_s29, %s370_s27 }
  0x22   : > { %p372_p7 = pnand %p371_p6, %p495_p4 }
  0x23   : > { %p377_p12 = por %p376_p11, %p375_p10 }
  0x24   : > { %p373_p9 = pneg %p372_p7 }
  0x26   : > { %p378_p13 = pnand %p377_p12, %p373_p9 }
  0x28   : > { %381 = shalt.err (!%p378_p13)
}
  0x29   : > { %301 = dma.vmem_to_hbm [thread:$0]  (%p495_p4), %s204_s6, 128, %s201_s17, %s189_s15  }
  0x2a PF: > { %p307_p0 = scmp.ge.s32.totalorder %s432_s16, 2  ;;  %s215_s5 = sand.u32 1, %s412_s12  }
  0x2b   : > { %s216_s7 = scalar_lea.sflag [#allocation5], %s215_s5 }
  0x2c   : > { %p304_p1 = pnand %p307_p0, %p502_p8 }
  0x2e   : > { %p305_p2 = pneg %p304_p1 }
  0x30   : > { %407 = dma.done.wait (%p305_p2), %s216_s7, 128  }
  0x31   : > { %409 = vsyncadd (%p305_p2), %s216_s7, 4294967168  ;;  %s17_s16 = sadd.s32 1, %s432_s16   ;;  %s563_s12 = smov %s416_s13 }
  0x32   : > { %p14_p3 = scmp.ge.s32.totalorder %s17_s16, 4   ;;  %s564_s13 = smov %s420_s14 }
  0x33   : > { %s565_s14 = smov %s508_s24  ;;  %s566_s15 = smov %s428_s0 }
  0x34   : > { %s567_s0 = smov %s569_s19  ;;  %16 = sbr.rel (!%p14_p3) target bundleno = 4 (0x4), region = 66 }
  0x39   :  { %221 = vsyncpa [#allocation5], 1 }
  0x3a   :  { %223 = vsyncpa [#allocation5 + $0x1], 1 }

</bundles_post_ra>
